<compile_context>
chip_gen: v7x
topology: tpu7x:2x2x1
jax: 0.10.0
libtpu: 0.0.40
codegen_flags: <defaults>
</compile_context>

<pallas_src>
import jax
import jax.numpy as jnp
from jax.experimental import pallas as pl
from jax.experimental.pallas import tpu as pltpu


def _round_up(x, m):
    return ((x + m - 1) // m) * m


def _pick_row_tile(H, W, cin, cout_pad, in_itemsize, max_rows=None,
                   vmem_budget_bytes=16 * 1024 * 1024):
    """Largest divisor of H whose double-buffered tile footprint fits the budget."""
    per_row = 3 * (W + 2) * cin * in_itemsize + W * cout_pad * 4
    cap = max(1, vmem_budget_bytes // (2 * per_row))   # x2: double buffering
    if max_rows is not None:
        cap = min(cap, max_rows)
    th = 1
    for d in range(1, H + 1):
        if H % d == 0 and d <= cap:
            th = d
    return th


def conv3x3_relu_kernel(x0_ref, x1_ref, x2_ref, w_ref, b_ref, out_ref):
    """One tile of Conv2d(3x3, pad=1) + bias + ReLU.

    x{0,1,2}_ref: (1, TH, W+2, Cin)  row-shifted padded input tiles (kh = 0,1,2)
    w_ref:        (9*Cin, Cout_pad)  HWIO weights flattened over (kh, kw, cin)
    b_ref:        (1, Cout_pad)      f32 bias (zero-padded)
    out_ref:      (1, TH, W, Cout_pad) f32
    """
    _, TH, Wp, Cin = x0_ref.shape
    W = Wp - 2
    Cout_pad = out_ref.shape[-1]

    # Build the (TH*W, 9*Cin) im2col patches in VMEM/vregs from the 3 shifted
    # tiles: the kw shifts are static slices of the tile (no HBM duplication).
    slabs = []
    for x_ref in (x0_ref, x1_ref, x2_ref):
        x = x_ref[0].astype(jnp.float32)              # (TH, W+2, Cin)
        for kw in range(3):
            slabs.append(x[:, kw:kw + W, :])          # (TH, W, Cin)
    patches = jnp.concatenate(slabs, axis=-1).reshape(TH * W, 9 * Cin)

    # Single fused MXU matmul over K = 9*Cin, f32 accumulation.
    acc = jnp.dot(patches.astype(w_ref.dtype), w_ref[...],
                  preferred_element_type=jnp.float32)
    acc = acc + b_ref[...]
    out_ref[0] = jnp.maximum(acc, 0.0).reshape(TH, W, Cout_pad)


def conv3x3_relu_layer(x_nhwc, w_hwio, bias, *, compute_dtype=jnp.bfloat16,
                       max_row_tile=None):
    """Apply one Conv2d(kernel=3, padding=1) + ReLU via the Pallas kernel."""
    B, H, W, Cin = x_nhwc.shape
    Cout = w_hwio.shape[-1]
    Cout_pad = _round_up(Cout, 128)          # lane-dense output stores
    Wp = W + 2

    # Pad spatially once; matmul operands travel in the compute dtype.
    xpad = jnp.pad(x_nhwc, ((0, 0), (1, 1), (1, 1), (0, 0))).astype(compute_dtype)
    # Three row-shifted views (kernel rows kh = 0, 1, 2). Replaces the 9x
    # materialized im2col; the remaining kw shifts happen inside the kernel.
    # TODO(synk): a halo-DMA (or element-indexed) input block would drop this 3x to 1x.
    x_sh = [xpad[:, kh:kh + H, :, :] for kh in range(3)]   # each (B, H, W+2, Cin)

    w9 = w_hwio.reshape(9 * Cin, Cout)                      # (kh, kw, cin) flattened
    w9 = jnp.pad(w9, ((0, 0), (0, Cout_pad - Cout))).astype(compute_dtype)
    b2 = jnp.pad(bias.reshape(1, Cout),
                 ((0, 0), (0, Cout_pad - Cout))).astype(jnp.float32)

    in_itemsize = jnp.dtype(compute_dtype).itemsize
    TH = _pick_row_tile(H, W, Cin, Cout_pad, in_itemsize, max_rows=max_row_tile)
    grid = (B, H // TH)

    x_spec = pl.BlockSpec((1, TH, Wp, Cin), lambda b, h: (b, h, 0, 0))
    w_spec = pl.BlockSpec((9 * Cin, Cout_pad), lambda b, h: (0, 0))
    b_spec = pl.BlockSpec((1, Cout_pad), lambda b, h: (0, 0))
    out_spec = pl.BlockSpec((1, TH, W, Cout_pad), lambda b, h: (b, h, 0, 0))

    M = B * H * W
    cost = pl.CostEstimate(
        flops=2 * M * 9 * Cin * Cout_pad,
        transcendentals=0,
        bytes_accessed=(3 * B * H * Wp * Cin * in_itemsize
                        + int(w9.size) * in_itemsize + int(b2.size) * 4
                        + M * Cout_pad * 4),
    )

    out_padded = pl.pallas_call(
        conv3x3_relu_kernel,
        out_shape=jax.ShapeDtypeStruct((B, H, W, Cout_pad), jnp.float32),
        grid=grid,
        in_specs=[x_spec, x_spec, x_spec, w_spec, b_spec],
        out_specs=out_spec,
        compiler_params=pltpu.CompilerParams(
            dimension_semantics=("parallel", "parallel"),  # megacore/v7x sharding
            vmem_limit_bytes=48 * 1024 * 1024,             # headroom under v7x 64 MiB
        ),
        cost_estimate=cost,
    )(x_sh[0], x_sh[1], x_sh[2], w9, b2)

    return out_padded[..., :Cout]


def init_conv_block_params(key, channels):
    """Deterministic synthetic init matching nn.Conv2d(channels[i], channels[i+1], 3)."""
    params = []
    for i in range(len(channels) - 1):
        cin, cout = channels[i], channels[i + 1]
        key, kw, kb = jax.random.split(key, 3)
        fan_in = cin * 3 * 3
        # PyTorch weight layout is (Cout, Cin, 3, 3); we store HWIO for the kernel.
        w_oihw = jax.random.normal(kw, (cout, cin, 3, 3), jnp.float32) * (
            1.0 / jnp.sqrt(fan_in)
        )
        b = jax.random.normal(kb, (cout,), jnp.float32) * 0.01
        w_hwio = jnp.transpose(w_oihw, (2, 3, 1, 0))
        params.append((w_hwio, b))
    return params


def conv_block_forward(x_nchw, params, *, compute_dtype=jnp.bfloat16,
                       max_row_tile=None):
    """Forward pass of ConvBlock: repeated conv3x3(pad=1) + ReLU. NCHW in/out."""
    # TODO(synk): fusing consecutive layers into one pallas_call (intermediate
    # activation tile kept in VMEM) would remove an HBM round-trip per layer pair.
    x = jnp.transpose(x_nchw, (0, 2, 3, 1))  # NCHW -> NHWC
    for w_hwio, b in params:
        x = conv3x3_relu_layer(x, w_hwio, b, compute_dtype=compute_dtype,
                               max_row_tile=max_row_tile)
    return jnp.transpose(x, (0, 3, 1, 2))    # NHWC -> NCHW


def _reference_forward(x_nchw, params, operand_dtype=None):
    """Pure-JAX reference (lax.conv). Optionally rounds operands to bf16 to
    match the kernel's compute dtype (accumulation stays f32)."""
    x = x_nchw
    for w_hwio, b in params:
        w_oihw = jnp.transpose(w_hwio, (3, 2, 0, 1))
        xin, win = x, w_oihw
        if operand_dtype is not None:
            xin = xin.astype(operand_dtype).astype(jnp.float32)
            win = win.astype(operand_dtype).astype(jnp.float32)
        y = jax.lax.conv_general_dilated(
            xin, win, window_strides=(1, 1), padding=((1, 1), (1, 1)),
            dimension_numbers=("NCHW", "OIHW", "NCHW"),
        )
        x = jnp.maximum(y + b[None, :, None, None], 0.0)
    return x


if __name__ == "__main__":
    key = jax.random.PRNGKey(0)
    kx, kp = jax.random.split(key)

    channels = [4, 8, 8]          # ConvBlock(channels=[4, 8, 8]) -> two conv layers
    B, H, W = 2, 16, 16
    x = jax.random.normal(kx, (B, channels[0], H, W), jnp.float32)  # NCHW

    params = init_conv_block_params(kp, channels)

    # max_row_tile=4 forces a multi-step H grid even at this toy size so the
    # tiled / double-buffered path is actually exercised.
    out = conv_block_forward(x, params, max_row_tile=4)
    out = jax.block_until_ready(out)
    assert out.shape == (B, channels[-1], H, W)

    # (1) kernel-math check: reference fed the same bf16-rounded operands.
    ref_bf16 = _reference_forward(x, params, operand_dtype=jnp.bfloat16)
    assert jnp.allclose(out, ref_bf16, atol=1e-2, rtol=1e-2), \
        "mismatch vs bf16-operand reference conv"

    # (2) module-semantics check: pure-f32 reference; tolerance covers the
    #     intentional bf16 rounding of matmul operands (accumulation is f32).
    ref_f32 = _reference_forward(x, params)
    assert jnp.allclose(out, ref_f32, atol=1e-1, rtol=1e-1), \
        "mismatch vs f32 reference conv"

    print("KERNEL_OK")
</pallas_src>

<mosaic_0001>
module attributes {stable_mosaic.version = 11 : i64} {
  func.func @conv3x3_relu_kernel(%arg0: i32, %arg1: i32, %arg2: memref<1x4x18x4xbf16, #tpu.memory_space<vmem>>, %arg3: memref<1x4x18x4xbf16, #tpu.memory_space<vmem>>, %arg4: memref<1x4x18x4xbf16, #tpu.memory_space<vmem>>, %arg5: memref<36x128xbf16, #tpu.memory_space<vmem>>, %arg6: memref<1x128xf32, #tpu.memory_space<vmem>>, %arg7: memref<1x4x16x128xf32, #tpu.memory_space<vmem>>) attributes {dimension_semantics = [#tpu.dimension_semantics<parallel>, #tpu.dimension_semantics<parallel>], iteration_bounds = array<i64: 2, 4>, scalar_prefetch = 0 : i64, scratch_operands = 0 : i64, tpu.core_type = #tpu.core_type<tc>, window_params = [{transform_indices = @transform_0, window_bounds = array<i64: 1, 4, 18, 4>}, {transform_indices = @transform_1, window_bounds = array<i64: 1, 4, 18, 4>}, {transform_indices = @transform_2, window_bounds = array<i64: 1, 4, 18, 4>}, {pipeline_mode = #tpu.pipeline_mode<synchronous>, transform_indices = @transform_3, window_bounds = array<i64: 36, 128>}, {pipeline_mode = #tpu.pipeline_mode<synchronous>, transform_indices = @transform_4, window_bounds = array<i64: 1, 128>}, {transform_indices = @transform_5, window_bounds = array<i64: 1, 4, 16, 128>}]} {
    %c0 = arith.constant 0 : index
    %c0_0 = arith.constant 0 : index
    %c0_1 = arith.constant 0 : index
    %c0_2 = arith.constant 0 : index
    %0 = vector.load %arg2[%c0, %c0_0, %c0_1, %c0_2] : memref<1x4x18x4xbf16, #tpu.memory_space<vmem>>, vector<1x4x18x4xbf16>
    %1 = vector.shape_cast %0 : vector<1x4x18x4xbf16> to vector<4x18x4xbf16>
    %2 = arith.extf %1 : vector<4x18x4xbf16> to vector<4x18x4xf32>
    %3 = vector.extract_strided_slice %2 {offsets = [0, 0, 0], sizes = [4, 16, 4], strides = [1, 1, 1]} : vector<4x18x4xf32> to vector<4x16x4xf32>
    %4 = vector.extract_strided_slice %2 {offsets = [0, 1, 0], sizes = [4, 16, 4], strides = [1, 1, 1]} : vector<4x18x4xf32> to vector<4x16x4xf32>
    %5 = vector.extract_strided_slice %2 {offsets = [0, 2, 0], sizes = [4, 16, 4], strides = [1, 1, 1]} : vector<4x18x4xf32> to vector<4x16x4xf32>
    %c0_3 = arith.constant 0 : index
    %c0_4 = arith.constant 0 : index
    %c0_5 = arith.constant 0 : index
    %c0_6 = arith.constant 0 : index
    %6 = vector.load %arg3[%c0_3, %c0_4, %c0_5, %c0_6] : memref<1x4x18x4xbf16, #tpu.memory_space<vmem>>, vector<1x4x18x4xbf16>
    %7 = vector.shape_cast %6 : vector<1x4x18x4xbf16> to vector<4x18x4xbf16>
    %8 = arith.extf %7 : vector<4x18x4xbf16> to vector<4x18x4xf32>
    %9 = vector.extract_strided_slice %8 {offsets = [0, 0, 0], sizes = [4, 16, 4], strides = [1, 1, 1]} : vector<4x18x4xf32> to vector<4x16x4xf32>
    %10 = vector.extract_strided_slice %8 {offsets = [0, 1, 0], sizes = [4, 16, 4], strides = [1, 1, 1]} : vector<4x18x4xf32> to vector<4x16x4xf32>
    %11 = vector.extract_strided_slice %8 {offsets = [0, 2, 0], sizes = [4, 16, 4], strides = [1, 1, 1]} : vector<4x18x4xf32> to vector<4x16x4xf32>
    %c0_7 = arith.constant 0 : index
    %c0_8 = arith.constant 0 : index
    %c0_9 = arith.constant 0 : index
    %c0_10 = arith.constant 0 : index
    %12 = vector.load %arg4[%c0_7, %c0_8, %c0_9, %c0_10] : memref<1x4x18x4xbf16, #tpu.memory_space<vmem>>, vector<1x4x18x4xbf16>
    %13 = vector.shape_cast %12 : vector<1x4x18x4xbf16> to vector<4x18x4xbf16>
    %14 = arith.extf %13 : vector<4x18x4xbf16> to vector<4x18x4xf32>
    %15 = vector.extract_strided_slice %14 {offsets = [0, 0, 0], sizes = [4, 16, 4], strides = [1, 1, 1]} : vector<4x18x4xf32> to vector<4x16x4xf32>
    %16 = vector.extract_strided_slice %14 {offsets = [0, 1, 0], sizes = [4, 16, 4], strides = [1, 1, 1]} : vector<4x18x4xf32> to vector<4x16x4xf32>
    %17 = vector.extract_strided_slice %14 {offsets = [0, 2, 0], sizes = [4, 16, 4], strides = [1, 1, 1]} : vector<4x18x4xf32> to vector<4x16x4xf32>
    %18 = tpu.concatenate %3, %4, %5, %9, %10, %11, %15, %16, %17 in 2 : vector<4x16x4xf32>, vector<4x16x4xf32>, vector<4x16x4xf32>, vector<4x16x4xf32>, vector<4x16x4xf32>, vector<4x16x4xf32>, vector<4x16x4xf32>, vector<4x16x4xf32>, vector<4x16x4xf32> -> vector<4x16x36xf32>
    %19 = vector.shape_cast %18 : vector<4x16x36xf32> to vector<64x36xf32>
    %20 = arith.truncf %19 : vector<64x36xf32> to vector<64x36xbf16>
    %c0_11 = arith.constant 0 : index
    %c0_12 = arith.constant 0 : index
    %21 = vector.load %arg5[%c0_11, %c0_12] : memref<36x128xbf16, #tpu.memory_space<vmem>>, vector<36x128xbf16>
    %cst = arith.constant dense<0.000000e+00> : vector<64x128xf32>
    %22 = tpu.matmul %20, %21, %cst {dimension_numbers = #tpu.dot_dimension_numbers<[1], [0], [0], [1], [0, 0, 1, 1], [], []>} : vector<64x36xbf16>, vector<36x128xbf16>, vector<64x128xf32> -> vector<64x128xf32>
    %c0_13 = arith.constant 0 : index
    %c0_14 = arith.constant 0 : index
    %23 = vector.load %arg6[%c0_13, %c0_14] : memref<1x128xf32, #tpu.memory_space<vmem>>, vector<1x128xf32>
    %24 = vector.broadcast %23 : vector<1x128xf32> to vector<64x128xf32>
    %25 = arith.addf %22, %24 : vector<64x128xf32>
    %cst_15 = arith.constant 0.000000e+00 : f32
    %26 = vector.broadcast %cst_15 : f32 to vector<64x128xf32>
    %27 = arith.maximumf %25, %26 : vector<64x128xf32>
    %28 = vector.shape_cast %27 : vector<64x128xf32> to vector<4x16x128xf32>
    %c0_16 = arith.constant 0 : index
    %c0_17 = arith.constant 0 : index
    %c0_18 = arith.constant 0 : index
    %c0_19 = arith.constant 0 : index
    %29 = vector.load %arg7[%c0_16, %c0_17, %c0_18, %c0_19] : memref<1x4x16x128xf32, #tpu.memory_space<vmem>>, vector<1x4x16x128xf32>
    %30 = vector.shape_cast %29 : vector<1x4x16x128xf32> to vector<4x16x128xf32>
    %31 = vector.shape_cast %28 : vector<4x16x128xf32> to vector<1x4x16x128xf32>
    tpu.vector_store %arg7[%c0_16, %c0_17, %c0_18, %c0_19], %31 {strides = array<i32>} : memref<1x4x16x128xf32, #tpu.memory_space<vmem>>, vector<1x4x16x128xf32>,
    return
  }
  func.func @transform_0(%arg0: i32, %arg1: i32) -> (i32, i32, i32, i32) {
    %c0_i32 = arith.constant 0 : i32
    %c0_i32_0 = arith.constant 0 : i32
    %c0_i32_1 = arith.constant 0 : i32
    return %arg0, %arg1, %c0_i32, %c0_i32_0 : i32, i32, i32, i32
  }
  func.func @transform_1(%arg0: i32, %arg1: i32) -> (i32, i32, i32, i32) {
    %c0_i32 = arith.constant 0 : i32
    %c0_i32_0 = arith.constant 0 : i32
    %c0_i32_1 = arith.constant 0 : i32
    return %arg0, %arg1, %c0_i32, %c0_i32_0 : i32, i32, i32, i32
  }
  func.func @transform_2(%arg0: i32, %arg1: i32) -> (i32, i32, i32, i32) {
    %c0_i32 = arith.constant 0 : i32
    %c0_i32_0 = arith.constant 0 : i32
    %c0_i32_1 = arith.constant 0 : i32
    return %arg0, %arg1, %c0_i32, %c0_i32_0 : i32, i32, i32, i32
  }
  func.func @transform_3(%arg0: i32, %arg1: i32) -> (i32, i32) {
    %c0_i32 = arith.constant 0 : i32
    %c0_i32_0 = arith.constant 0 : i32
    %c0_i32_1 = arith.constant 0 : i32
    return %c0_i32, %c0_i32_0 : i32, i32
  }
  func.func @transform_4(%arg0: i32, %arg1: i32) -> (i32, i32) {
    %c0_i32 = arith.constant 0 : i32
    %c0_i32_0 = arith.constant 0 : i32
    %c0_i32_1 = arith.constant 0 : i32
    return %c0_i32, %c0_i32_0 : i32, i32
  }
  func.func @transform_5(%arg0: i32, %arg1: i32) -> (i32, i32, i32, i32) {
    %c0_i32 = arith.constant 0 : i32
    %c0_i32_0 = arith.constant 0 : i32
    %c0_i32_1 = arith.constant 0 : i32
    return %arg0, %arg1, %c0_i32, %c0_i32_0 : i32, i32, i32, i32
  }
}

</mosaic_0001>

<bundles_post_ra>
// kernel: tpu_custom_call.1
= control target key start
LH: loop header
LB: loop body
LE: loop exit
PB: predicated region body
PF: predicated region fallthrough
CT: control target
= control target key end

     0   :  { %10 = vsyncpa [#allocation3], 0  ;;  %s2088_s0 = inlined_call_operand.vmem [shape: bf16[2,16,18,4], index: 0, kind: input, shape index: {}]   ;;  %s2089_s1 = inlined_call_operand.vmem [shape: bf16[2,16,18,4], index: 1, kind: input, shape index: {}]   ;;  %s2090_s2 = inlined_call_operand.vmem [shape: bf16[2,16,18,4], index: 2, kind: input, shape index: {}]   ;;  %s2091_s3 = inlined_call_operand.vmem [shape: bf16[36,128], index: 3, kind: input, shape index: {}]   ;;  %s2092_s4 = inlined_call_operand.vmem [shape: f32[1,128], index: 4, kind: input, shape index: {}]   ;;  %s2093_s5 = inlined_call_operand.hbm [shape: f32[2,16,16,128], index: 5, kind: output, shape index: {}]  }
   0x1   :  { %12 = vsyncpa [#allocation3 + $0x1], 0  ;;  %s1568_s18 = smov 0   ;;  %s1570_s19 = smov 0  }
   0x2   :  { %s1572_s20 = smov 0   ;;  %s1574_s21 = smov 0  }
   0x3   :  { %s1576_s22 = smov 0   ;;  %s1578_s23 = smov 0  }
   0x4   :  { %s1580_s24 = smov 0   ;;  %s1582_s25 = smov 0  }
   0x5 LB: > { %s1103_s26 = sadd.s32 4294967295, %s1526_s25   ;;  %s1104_s27 = sadd.s32 4294967294, %s1526_s25   ;;  %s1526_s25 = sphi %s1582_s25, %s18_s25   ;;  %s1522_s24 = sphi %s1580_s24, %s2102_s24   ;;  %s1518_s23 = sphi %s1578_s23, %s2101_s23   ;;  %s1514_s22 = sphi %s1576_s22, %s2100_s22   ;;  %s1510_s21 = sphi %s1574_s21, %s2099_s21   ;;  %s1506_s20 = sphi %s1572_s20, %s2098_s20   ;;  %s1502_s19 = sphi %s1570_s19, %s2097_s19   ;;  %s1498_s18 = sphi %s1568_s18, %s2096_s18  }
   0x6   : > { %s27_s28 = sadd.s32 1, %s1518_s23  ;;  %s30_s29 = sadd.s32 1, %s1522_s24 }
   0x7   : > { %p28_p0 = scmp.ge.s32.totalorder %s27_s28, 4  ;;  %p175_p1 = scmp.ne.s32.totalorder %s1506_s20, %s1502_s19 }
   0x8   : > { %p176_p2 = scmp.eq.s32.totalorder %s1103_s26, 7  ;;  %p181_p5 = scmp.ne.s32.totalorder %s1502_s19, %s1498_s18 }
   0x9   : > { %s2104_s28 = smov (%p28_p0, %s27_s28), 0  ;;  %s2106_s29 = smov (!%p28_p0, %s30_s29), %s1522_s24 }
   0xa   : > { %s161_s30 = ssub.s32 %s1518_s23, %s2104_s28  ;;  %p1619_p3 = por %p176_p2, %p175_p1 }
   0xb   : > { %p32_p4 = scmp.ge.s32.totalorder %s2106_s29, 2  ;;  %p182_p6 = scmp.eq.s32.totalorder %s1104_s27, 7 }
   0xc   : > { %p1107_p7 = scmp.ge.s32.totalorder %s1526_s25, 1  ;;  %p248_p9 = scmp.lt.s32.totalorder %s1526_s25, 9 }
   0xd   : > { %s2108_s29 = smov (%p32_p4, %s2106_s29), 0  ;;  %p1628_p8 = por %p182_p6, %p181_p5 }
   0xe   : > { %s160_s8 = ssub.s32 %s1522_s24, %s2108_s29  ;;  %s165_s9 = sadd.s32 1, %s1506_s20 }
   0xf   : > { %s162_s10 = sor.u32 %s161_s30, %s160_s8  ;;  %p249_p10 = pnand %p1107_p7, %p248_p9 }
  0x10   : > { %p163_p11 = scmp.eq.s32.totalorder %s162_s10, 0  ;;  %s1109_s12 = sshll.u32 (!%p249_p10), %s1510_s21, 2  ;;  %vm420_vm0 = vcmask (!%p249_p10), 1046528   ;;  %vm465_vm1 = vcmask (!%p249_p10), 1045504   ;;  %vm874_vm2 = vcmask (!%p249_p10), 1041408   ;;  %vm758_vm3 = vcmask (!%p249_p10), 31744  }
  0x11   : > { %252 = sbr.rel (%p249_p10) target bundleno = 454 (0x1c6), region = 40  ;;  %p302_p12 = scmp.lt.s32.totalorder (!%p249_p10), %s1514_s22, 1  ;;  %vm767_vm4 = vcmask (!%p249_p10), 64512   ;;  %vm776_vm5 = vcmask (!%p249_p10), 97280   ;;  %vm785_vm6 = vcmask (!%p249_p10), 130048   ;;  %vm794_vm7 = vcmask (!%p249_p10), 162816  }
  0x12   : > { %s1637_s11 = scalar_select %p163_p11, %s1506_s20, %s165_s9  }
  0x13   : > { %p304_p13 = scmp.lt.s32.totalorder (!%p249_p10), %s1109_s12, 15  ;;  %s1535_s26 = smov (!%p249_p10), 32   ;;  %vm803_vm8 = vcmask (!%p249_p10), 195584   ;;  %vm812_vm9 = vcmask (!%p249_p10), 228352   ;;  %vm821_vm10 = vcmask (!%p249_p10), 261120   ;;  %vm861_vm11 = vcmask (!%p249_p10), 293888  }
  0x14   : > { %s1130_s9 = sshll.u32 (!%p249_p10), %s1510_s21, 3 }
  0x18   : > { %s303_s13 = scalar_select %p302_p12, %s1514_s22, 1 }
  0x19   : > { %s2110_s12 = smov (!%p304_p13, %s1109_s12), 15 }
  0x1a   : > { %s1188_s14 = smul.u32 48, %s303_s13  ;;  %s1529_s13 = smov 4  }
  0x1b   : > { %s1187_s15 = smul.u32 3, %s2110_s12  ;;  %s1528_s12 = smov 12  }
  0x1d   : > { %s308_s16 = sadd.s32 %s1188_s14, %s1187_s15  ;;  %s1530_s14 = smov 8  }
  0x1e   : > { %s1642_s17 = sshll.u32 %s308_s16, 2  ;;  %s1531_s15 = smov 16  }
  0x1f   : > { %s1648_s30 = scalar_lea.vmem %s2089_s1, %s1642_s17  ;;  %s1654_s10 = scalar_lea.vmem %s2088_s0, %s1642_s17 }
  0x20   : > { %v1156_v0 = vld [vmem:[%s1648_s30 + $0x18] sm:$0xff]   ;;  %v1140_v1 = vld [vmem:[%s1648_s30] sm:$0xff]   ;;  %v339_v2 = vld [vmem:[%s1654_s10 + $0xc] sm:$0xff]   ;;  %s1791_s27 = scalar_lea.vmem %s2090_s2, %s1642_s17  ;;  %s1532_s17 = smov 20  }
  0x21   : > { %v1659_v3 = vunpack.c.l.bf16 %v1156_v0  ;;  %v1661_v4 = vunpack.c.h.bf16 %v1156_v0  ;;  %v1663_v5 = vunpack.c.l.bf16 %v1140_v1  ;;  %v1665_v6 = vunpack.c.h.bf16 %v1140_v1  ;;  %v1668_v7 = vld [vmem:[%s1654_s10 + $0x14] sm:$0x1]  ;;  %v1132_v8 = vld [vmem:[%s1654_s10] sm:$0xff]   ;;  %v338_v9 = vld [vmem:[%s1654_s10 + $0x8] sm:$0x1] }
  0x22   : > { %v1672_v10 = vunpack.c.l.bf16 %v339_v2  ;;  %v1674_v11 = vunpack.c.h.bf16 %v339_v2  ;;  %v353_v12 = vunpack.c.l.bf16 %v1668_v7  ;;  %v1677_v13 = vunpack.c.l.bf16 %v1132_v8  ;;  %v345_v14 = vld [vmem:[%s1654_s10 + $0x24] sm:$0xff]   ;;  %v347_v19 = vld [vmem:[%s1654_s10 + $0x2c] sm:$0x1]  ;;  %v1155_v20 = vld [vmem:[%s1654_s10 + $0x18] sm:$0xff]  }
  0x23   : > { %v1274_v15 = vpack.i.bf16 %v1661_v4, %v1659_v3  ;;  %v1269_v16 = vpack.i.bf16 %v1665_v6, %v1663_v5  ;;  %v1684_v17 = vunpack.c.h.bf16 %v1132_v8  ;;  %v350_v18 = vunpack.c.l.bf16 %v338_v9  ;;  %v344_v33 = vld [vmem:[%s1654_s10 + $0x20] sm:$0x1]  ;;  %v369_v62 = vld [vmem:[%s1648_s30 + $0x24] sm:$0xff]   ;;  %v363_v8 = vld [vmem:[%s1648_s30 + $0xc] sm:$0xff]   ;;  %s1126_s10 = sshll.u32 %s1514_s22, 5 }
  0x24   : > { %v426_v21 = vrot.slane %v1672_v10, 1  ;;  %v427_v22 = vrot.slane %v1674_v11, 1  ;;  %v429_v23 = vrot.slane %v353_v12, 1  ;;  %v421_v24 = vrot.slane %v1677_v13, 1 }
  0x25   : > { %1275 = vrot.lane.b32.xlu1 %v1274_v15, %s1528_s12  ;;  %1270 = vrot.lane.b32.xlu0 %v1269_v16, %s1528_s12  ;;  %v422_v25 = vrot.slane %v1684_v17, 1  ;;  %v424_v26 = vrot.slane %v350_v18, 1  ;;  %v1696_v27 = vunpack.c.l.bf16 %v345_v14  ;;  %v1698_v28 = vunpack.c.h.bf16 %v345_v14 }
  0x26   : > { %v428_v29 = vsel %vm420_vm0, %v426_v21, %v427_v22  ;;  %v430_v30 = vsel %vm420_vm0, %v427_v22, %v429_v23  ;;  %v359_v31 = vunpack.c.l.bf16 %v347_v19  ;;  %v1702_v32 = vunpack.c.l.bf16 %v1155_v20  ;;  %v362_v23 = vld [vmem:[%s1648_s30 + $0x8] sm:$0x1] }
  0x27   : > { %v1289_v34 = vpack.i.bf16 %v430_v30, %v428_v29  ;;  %v423_v35 = vsel %vm420_vm0, %v421_v24, %v422_v25  ;;  %v425_v36 = vsel %vm420_vm0, %v422_v25, %v424_v26  ;;  %v436_v37 = vrot.slane %v1696_v27, 1  ;;  %v371_v29 = vld [vmem:[%s1648_s30 + $0x2c] sm:$0x1] }
  0x28   : > { %v1279_v38 = vpack.i.bf16 %v425_v36, %v423_v35  ;;  %v437_v39 = vrot.slane %v1698_v28, 1  ;;  %v439_v40 = vrot.slane %v359_v31, 1  ;;  %v1709_v41 = vunpack.c.h.bf16 %v1155_v20 }
  0x29   : > { %1290 = vrot.lane.b32.xlu1 %v1289_v34, %s1529_s13  ;;  %v356_v42 = vunpack.c.l.bf16 %v344_v33  ;;  %v431_v43 = vrot.slane %v1702_v32, 1  ;;  %v476_v44 = vrot.slane %v1702_v32, 2  ;;  %v466_v45 = vrot.slane %v1677_v13, 2 }
  0x2a   : > { %1280 = vrot.lane.b32.xlu0 %v1279_v38, %s1529_s13  ;;  %v438_v46 = vsel %vm420_vm0, %v436_v37, %v437_v39  ;;  %v440_v47 = vsel %vm420_vm0, %v437_v39, %v439_v40  ;;  %v432_v48 = vrot.slane %v1709_v41, 1  ;;  %v477_v49 = vrot.slane %v1709_v41, 2  ;;  %v365_v37 = vld [vmem:[%s1648_s30 + $0x14] sm:$0x1] }
  0x2b   : > { %v1294_v50 = vpack.i.bf16 %v440_v47, %v438_v46  ;;  %v434_v51 = vrot.slane %v356_v42, 1  ;;  %v479_v52 = vrot.slane %v356_v42, 2  ;;  %v467_v53 = vrot.slane %v1684_v17, 2 }
  0x2c   : > { %v433_v54 = vsel %vm420_vm0, %v431_v43, %v432_v48  ;;  %v478_v55 = vsel %vm465_vm1, %v476_v44, %v477_v49  ;;  %v469_v56 = vrot.slane %v350_v18, 2  ;;  %v481_v57 = vrot.slane %v1696_v27, 2  ;;  %v368_v18 = vld [vmem:[%s1648_s30 + $0x20] sm:$0x1]  ;;  %s1533_s30 = smov 24  }
  0x2d   : > { %1295 = vrot.lane.b32.xlu1 %v1294_v50, %s1529_s13  ;;  %v435_v58 = vsel %vm420_vm0, %v432_v48, %v434_v51  ;;  %v480_v59 = vsel %vm465_vm1, %v477_v49, %v479_v52  ;;  %v468_v60 = vsel %vm465_vm1, %v466_v45, %v467_v53  ;;  %v482_v61 = vrot.slane %v1698_v28, 2 }
  0x2e   : > { %v1284_v63 = vpack.i.bf16 %v435_v58, %v433_v54  ;;  %v1304_v0 = vpack.i.bf16 %v480_v59, %v478_v55  ;;  %v470_v1 = vsel %vm465_vm1, %v467_v53, %v469_v56  ;;  %v484_v2 = vrot.slane %v359_v31, 2 }
  0x2f   : > { %v1299_v9 = vpack.i.bf16 %v470_v1, %v468_v60  ;;  %v483_v14 = vsel %vm465_vm1, %v481_v57, %v482_v61  ;;  %v471_v15 = vrot.slane %v1672_v10, 2  ;;  %v472_v16 = vrot.slane %v1674_v11, 2 }
  0x30   : > { %1285 = vrot.lane.b32.xlu0 %v1284_v63, %s1529_s13  ;;  %v485_v19 = vsel %vm465_vm1, %v482_v61, %v484_v2  ;;  %v474_v20 = vrot.slane %v353_v12, 2  ;;  %v1740_v21 = vunpack.c.l.bf16 %v369_v62  ;;  %v1742_v22 = vunpack.c.h.bf16 %v369_v62  ;;  %s1534_s13 = smov 28  }
  0x31   : > { %1305 = vrot.lane.b32.xlu1 %v1304_v0, %s1530_s14  ;;  %v1319_v24 = vpack.i.bf16 %v485_v19, %v483_v14  ;;  %v473_v25 = vsel %vm465_vm1, %v471_v15, %v472_v16  ;;  %v1747_v26 = vunpack.c.l.bf16 %v363_v8  ;;  %v1751_v31 = vunpack.c.h.bf16 %v363_v8 }
  0x32   : > { %v475_v30 = vsel %vm465_vm1, %v472_v16, %v474_v20  ;;  %v380_v7 = vunpack.c.l.bf16 %v368_v18  ;;  %v556_v12 = vrot.slane %v1659_v3, 1  ;;  %v1324_v34 = vpack.i.bf16 %v1742_v22, %v1740_v21 }
  0x33   : > { %v1309_v33 = vpack.i.bf16 %v475_v30, %v473_v25  ;;  %v557_v35 = vrot.slane %v1661_v4, 1  ;;  %v374_v36 = vunpack.c.l.bf16 %v362_v23  ;;  %v546_v39 = vrot.slane %v1663_v5, 1  ;;  %v1157_v23 = vld [vmem:[%s1791_s27 + $0x18] sm:$0xff]   ;;  %v1148_v30 = vld [vmem:[%s1791_s27] sm:$0xff]  }
  0x34   : > { %1300 = vrot.lane.b32.xlu0 %v1299_v9, %s1530_s14  ;;  %v559_v38 = vrot.slane %v380_v7, 1  ;;  %v547_v40 = vrot.slane %v1665_v6, 1  ;;  %v383_v42 = vunpack.c.l.bf16 %v371_v29  ;;  %v561_v45 = vrot.slane %v1740_v21, 1 }
  0x35   : > { %1320 = vrot.lane.b32.xlu1 %v1319_v24, %s1530_s14  ;;  %v558_v43 = vsel %vm420_vm0, %v556_v12, %v557_v35  ;;  %v549_v44 = vrot.slane %v374_v36, 1  ;;  %v562_v46 = vrot.slane %v1742_v22, 1  ;;  %v377_v49 = vunpack.c.l.bf16 %v365_v37  ;;  %v1799_v24 = vld [vmem:[%s1791_s27 + $0x20] sm:$0x1]  ;;  %v1815_v37 = vld [vmem:[%s1791_s27 + $0x2c] sm:$0x1] }
  0x36   : > { %v560_v47 = vsel %vm420_vm0, %v557_v35, %v559_v38  ;;  %v564_v48 = vrot.slane %v383_v42, 1  ;;  %v1314_v50 = vpack.i.bf16 %v1751_v31, %v1747_v26  ;;  %v548_v52 = vsel %vm420_vm0, %v546_v39, %v547_v40 }
  0x37   : > { %v1334_v51 = vpack.i.bf16 %v560_v47, %v558_v43  ;;  %v550_v53 = vsel %vm420_vm0, %v547_v40, %v549_v44  ;;  %v563_v54 = vsel %vm420_vm0, %v561_v45, %v562_v46  ;;  %v551_v56 = vrot.slane %v1747_v26, 1  ;;  %v393_v40 = vld [vmem:[%s1791_s27 + $0x24] sm:$0xff]  }
  0x38   : > { %1310 = vrot.lane.b32.xlu0 %v1309_v33, %s1530_s14  ;;  %v565_v55 = vsel %vm420_vm0, %v562_v46, %v564_v48  ;;  %v552_v57 = vrot.slane %v1751_v31, 1  ;;  %v554_v58 = vrot.slane %v377_v49, 1  ;;  %v600_v59 = vrot.slane %v1659_v3, 2  ;;  %v1808_v33 = vld [vmem:[%s1791_s27 + $0x8] sm:$0x1] }
  0x39   : > { %1325 = vrot.lane.b32.xlu1 %v1324_v34, %s1528_s12  ;;  %v601_v60 = vrot.slane %v1661_v4, 2  ;;  %v603_v61 = vrot.slane %v380_v7, 2  ;;  %v1329_v62 = vpack.i.bf16 %v550_v53, %v548_v52  ;;  %v1344_v63 = vpack.i.bf16 %v565_v55, %v563_v54  ;;  %v1840_v55 = vld [vmem:[%s1791_s27 + $0x14] sm:$0x1] }
  0x3a   : > { %v553_v0 = vsel %vm420_vm0, %v551_v56, %v552_v57  ;;  %v590_v1 = vrot.slane %v1663_v5, 2  ;;  %v591_v2 = vrot.slane %v1665_v6, 2  ;;  %v555_v8 = vsel %vm420_vm0, %v552_v57, %v554_v58 }
  0x3b   : > { %v602_v3 = vsel %vm465_vm1, %v600_v59, %v601_v60  ;;  %v604_v4 = vsel %vm465_vm1, %v601_v60, %v603_v61  ;;  %v593_v9 = vrot.slane %v374_v36, 2  ;;  %v605_v14 = vrot.slane %v1740_v21, 2 }
  0x3c   : > { %1315 = vrot.lane.b32.xlu0 %v1314_v50, %s1528_s12  ;;  %v606_v15 = vrot.slane %v1742_v22, 2  ;;  %v608_v16 = vrot.slane %v383_v42, 2  ;;  %v1339_v5 = vpack.i.bf16 %v555_v8, %v553_v0  ;;  %v1354_v6 = vpack.i.bf16 %v604_v4, %v602_v3  ;;  %v387_v42 = vld [vmem:[%s1791_s27 + $0xc] sm:$0xff]   ;;  %s298_s27 = sand.u32 1, %s1502_s19   ;;  %s973_s12 = sadd.s32 %s1130_s9, %s1126_s10 }
  0x3d   : > { %1335 = vrot.lane.b32.xlu1 %v1334_v51, %s1531_s15  ;;  %v592_v18 = vsel %vm465_vm1, %v590_v1, %v591_v2  ;;  %v594_v19 = vsel %vm465_vm1, %v591_v2, %v593_v9  ;;  %v595_v20 = vrot.slane %v1747_v26, 2  ;;  %v596_v21 = vrot.slane %v1751_v31, 2  ;;  %v1429_v2 = vld [vmem:[%s2091_s3] sm:$0xff]   ;;  %s1108_s8 = sshll.u32 %s298_s27, 6  ;;  %s1127_s22 = sshll.u32 %s973_s12, 7 }
  0x3e   : > { %v598_v22 = vrot.slane %v377_v49, 2  ;;  %v607_v25 = vsel %vm465_vm1, %v605_v14, %v606_v15  ;;  %v609_v29 = vsel %vm465_vm1, %v606_v15, %v608_v16  ;;  %v1349_v7 = vpack.i.bf16 %v594_v19, %v592_v18  ;;  %1165 = vmatprep.subr.bf16.mxu0 %v1429_v2  ;;  %1179 = vmatprep.subr.bf16.mxu1 %v1429_v2 }
  0x3f   : > { %v1804_v12 = vunpack.c.l.bf16 %v1157_v23  ;;  %v404_v26 = vunpack.c.l.bf16 %v1799_v24  ;;  %v1364_v31 = vpack.i.bf16 %v609_v29, %v607_v25  ;;  %v597_v34 = vsel %vm465_vm1, %v595_v20, %v596_v21  ;;  %1166 = vmatpush3.bf16.msra.mxu0 %v1429_v2  ;;  %1182 = vmatpush3.bf16.msra.mxu1 %v1429_v2 }
  0x40   : > { %1330 = vrot.lane.b32.xlu0 %v1329_v62, %s1531_s15  ;;  %v599_v35 = vsel %vm465_vm1, %v596_v21, %v598_v22  ;;  %v1812_v36 = vunpack.c.h.bf16 %v1157_v23  ;;  %v1817_v38 = vunpack.c.l.bf16 %v1148_v30  ;;  %v1819_v39 = vunpack.c.h.bf16 %v1148_v30  ;;  %v1430_v21 = vld [vmem:[%s2091_s3 + $0x8] sm:$0xff]  }
  0x41   : > { %1345 = vrot.lane.b32.xlu1 %v1344_v63, %s1531_s15  ;;  %v680_v43 = vrot.slane %v1804_v12, 1  ;;  %v398_v45 = vunpack.c.l.bf16 %v1808_v33  ;;  %v1359_v46 = vpack.i.bf16 %v599_v35, %v597_v34  ;;  %v683_v47 = vrot.slane %v404_v26, 1  ;;  %1167 = vmatprep.subr.bf16.mxu0 %v1430_v21  ;;  %v1431_v35 = vld [vmem:[%s2091_s3 + $0x10] ss:$0 sps:$4 sm:$0x33]  }
  0x42   : > { %v681_v44 = vrot.slane %v1812_v36, 1  ;;  %v407_v48 = vunpack.c.l.bf16 %v1815_v37  ;;  %v1374_v49 = vpack.i.bf16 %v1812_v36, %v1804_v12  ;;  %v1829_v50 = vunpack.c.l.bf16 %v393_v40  ;;  %1180 = vmatprep.subr.bf16.mxu1 %v1430_v21 }
  0x43   : > { %v1831_v51 = vunpack.c.h.bf16 %v393_v40  ;;  %v1369_v52 = vpack.i.bf16 %v1819_v39, %v1817_v38  ;;  %v1835_v53 = vunpack.c.l.bf16 %v387_v42  ;;  %v1837_v54 = vunpack.c.h.bf16 %v387_v42  ;;  %1168 = vmatpush3.bf16.msra.mxu0 %v1430_v21  ;;  %1183 = vmatpush3.bf16.msra.mxu1 %v1430_v21 }
  0x44   : > { %1340 = vrot.lane.b32.xlu0 %v1339_v5, %s1531_s15  ;;  %v682_v56 = vsel %vm420_vm0, %v680_v43, %v681_v44  ;;  %v670_v57 = vrot.slane %v1817_v38, 1  ;;  %v671_v58 = vrot.slane %v1819_v39, 1  ;;  %v673_v59 = vrot.slane %v398_v45, 1  ;;  %1185 = vmatprep.subr.msk.bf16.mxu0 %vm874_vm2, %v1431_v35 }
  0x45   : > { %1355 = vrot.lane.b32.xlu1 %v1354_v6, %s1532_s17  ;;  %v684_v60 = vsel %vm420_vm0, %v681_v44, %v683_v47  ;;  %v685_v61 = vrot.slane %v1829_v50, 1  ;;  %v686_v62 = vrot.slane %v1831_v51, 1  ;;  %v688_v63 = vrot.slane %v407_v48, 1  ;;  %1186 = vmatprep.subr.msk.bf16.mxu1 %vm874_vm2, %v1431_v35 }
  0x46   : > { %v1384_v0 = vpack.i.bf16 %v1831_v51, %v1829_v50  ;;  %v401_v1 = vunpack.c.l.bf16 %v1840_v55  ;;  %v1379_v8 = vpack.i.bf16 %v1837_v54, %v1835_v53  ;;  %v1394_v3 = vpack.i.bf16 %v684_v60, %v682_v56 }
  0x47   : > { %v672_v4 = vsel %vm420_vm0, %v670_v57, %v671_v58  ;;  %v674_v9 = vsel %vm420_vm0, %v671_v58, %v673_v59  ;;  %v687_v14 = vsel %vm420_vm0, %v685_v61, %v686_v62  ;;  %v689_v15 = vsel %vm420_vm0, %v686_v62, %v688_v63 }
  0x48   : > { %1350 = vrot.lane.b32.xlu0 %v1349_v7, %s1532_s17  ;;  %v675_v16 = vrot.slane %v1835_v53, 1  ;;  %v676_v5 = vrot.slane %v1837_v54, 1  ;;  %v678_v6 = vrot.slane %v401_v1, 1  ;;  %v724_v18 = vrot.slane %v1804_v12, 2 }
  0x49   : > { %1365 = vrot.lane.b32.xlu1 %v1364_v31, %s1532_s17  ;;  %v725_v19 = vrot.slane %v1812_v36, 2  ;;  %v727_v20 = vrot.slane %v404_v26, 2  ;;  %v1389_v22 = vpack.i.bf16 %v674_v9, %v672_v4  ;;  %v1404_v23 = vpack.i.bf16 %v689_v15, %v687_v14 }
  0x4a   : > { %v677_v24 = vsel %vm420_vm0, %v675_v16, %v676_v5  ;;  %v714_v25 = vrot.slane %v1817_v38, 2  ;;  %v715_v29 = vrot.slane %v1819_v39, 2  ;;  %v679_v30 = vsel %vm420_vm0, %v676_v5, %v678_v6 }
  0x4b   : > { %v726_v7 = vsel %vm465_vm1, %v724_v18, %v725_v19  ;;  %v728_v12 = vsel %vm465_vm1, %v725_v19, %v727_v20  ;;  %v717_v26 = vrot.slane %v398_v45, 2  ;;  %v729_v33 = vrot.slane %v1829_v50, 2 }
  0x4c   : > { %1360 = vrot.lane.b32.xlu0 %v1359_v46, %s1532_s17  ;;  %v730_v31 = vrot.slane %v1831_v51, 2  ;;  %v732_v34 = vrot.slane %v407_v48, 2  ;;  %v1399_v36 = vpack.i.bf16 %v679_v30, %v677_v24  ;;  %v1414_v37 = vpack.i.bf16 %v728_v12, %v726_v7  ;;  %s2035_s17 = scalar_lea.sflag [#allocation3], %s298_s27 }
  0x4d   : > { %1375 = vrot.lane.b32.xlu1 %v1374_v49, %s1533_s30  ;;  %v716_v38 = vsel %vm465_vm1, %v714_v25, %v715_v29  ;;  %v876_v39 = vsel %vm874_vm2, %v1431_v35, 0  ;;  %v718_v40 = vsel %vm465_vm1, %v715_v29, %v717_v26  ;;  %v719_v42 = vrot.slane %v1835_v53, 2 }
  0x4e   : > { %v720_v43 = vrot.slane %v1837_v54, 2  ;;  %v722_v44 = vrot.slane %v401_v1, 2  ;;  %v731_v45 = vsel %vm465_vm1, %v729_v33, %v730_v31  ;;  %v733_v46 = vsel %vm465_vm1, %v730_v31, %v732_v34  ;;  %1170 = vmatpush3.bf16.msra.mxu0 %v876_v39  ;;  %1184 = vmatpush3.bf16.msra.mxu1 %v876_v39 }
  0x4f   : > { %v1409_v47 = vpack.i.bf16 %v718_v40, %v716_v38  ;;  %v1424_v48 = vpack.i.bf16 %v733_v46, %v731_v45 }
  0x50   : > { %1370 = vrot.lane.b32.xlu0 %v1369_v52, %s1533_s30  ;;  %v721_v49 = vsel %vm465_vm1, %v719_v42, %v720_v43  ;;  %v723_v50 = vsel %vm465_vm1, %v720_v43, %v722_v44 }
  0x51   : > { %1385 = vrot.lane.b32.xlu1 %v1384_v0, %s1533_s30  ;;  %v1419_v51 = vpack.i.bf16 %v723_v50, %v721_v49 }
  0x54   : > { %1380 = vrot.lane.b32.xlu0 %v1379_v8, %s1533_s30 }
  0x55   : > { %1395 = vrot.lane.b32.xlu1 %v1394_v3, %s1534_s13 }
  0x58   : > { %1390 = vrot.lane.b32.xlu0 %v1389_v22, %s1534_s13 }
  0x59   : > { %1405 = vrot.lane.b32.xlu1 %v1404_v23, %s1534_s13 }
  0x5c   : > { %1400 = vrot.lane.b32.xlu0 %v1399_v36, %s1534_s13  ;;  %s300_s13 = scalar_lea.vmem [#allocation2], %s1108_s8  ;;  %s1536_s8 = smov [#allocation2]  }
  0x5d   : > { %1415 = vrot.lane.b32.xlu1 %v1414_v37, %s1535_s26  ;;  %s976_s21 = sshll.u32 %s300_s13, 4  ;;  %s1436_s9 = sshll.u32 %s1536_s8, 4  ;;  %s2026_s21 = int_to_ptr.vmem [resolvable:$true] %s976_s21  ;;  %s1437_s9 = int_to_ptr.vmem [resolvable:$false] %s1436_s9 }
  0x5e   : > { %s1432_s30 = scalar_lea.vmem %s2026_s21, 1024  ;;  %s1438_s10 = scalar_lea.vmem %s1437_s9, 2048 }
  0x5f   : > { %p1433_p0 = scmp.ne.s32.totalorder %s2026_s21, %s1432_s30  ;;  %p1439_p4 = scmp.lt.s32.totalorder %s2026_s21, %s1437_s9 }
  0x60   : > { %1410 = vrot.lane.b32.xlu0 %v1409_v47, %s1535_s26  ;;  %p1440_p5 = scmp.lt.s32.totalorder %s1438_s10, %s1432_s30 }
  0x61   : > { %1425 = vrot.lane.b32.xlu1 %v1424_v48, %s1535_s26  ;;  %p1434_p1 = pnand %p1433_p0, %p1619_p3 }
  0x62   : > { %p1441_p6 = por %p1440_p5, %p1439_p4 }
  0x63   : > { %p1435_p2 = pneg %p1434_p1 }
  0x64   : > { %1420 = vrot.lane.b32.xlu0 %v1419_v51, %s1535_s26  ;;  %s2031_s26 = scalar_lea.hbm %s2093_s5, %s1127_s22 }
  0x65   : > { %p1442_p7 = pnand %p1441_p6, %p1435_p2 }
  0x97   : > { %v1276_v52 = vpop.permute.xlu1 %1275  ;;  %v1886_v53 = vpop.permute.xlu0 %1270 }
  0x98   : > { %v1278_v16 = vunpack.i.h.bf16 %v1276_v52  ;;  %v1277_v5 = vunpack.i.l.bf16 %v1276_v52  ;;  %v1273_v7 = vunpack.i.h.bf16 %v1886_v53  ;;  %v1272_v31 = vunpack.i.l.bf16 %v1886_v53 }
  0x9b   : > { %v1291_v54 = vpop.permute.xlu1 %1290 }
  0x9c   : > { %v1281_v55 = vpop.permute.xlu0 %1280  ;;  %v1293_v6 = vunpack.i.h.bf16 %v1291_v54  ;;  %v1292_v18 = vunpack.i.l.bf16 %v1291_v54 }
  0x9d   : > { %v1283_v19 = vunpack.i.h.bf16 %v1281_v55  ;;  %v1282_v20 = vunpack.i.l.bf16 %v1281_v55 }
  0x9e   : > { %v762_v34 = vsel %vm758_vm3, %v1674_v11, %v1293_v6 }
  0x9f   : > { %v1296_v56 = vpop.permute.xlu1 %1295  ;;  %v760_v36 = vsel %vm758_vm3, %v1684_v17, %v1283_v19  ;;  %v759_v37 = vsel %vm758_vm3, %v1677_v13, %v1282_v20 }
  0xa0   : > { %v1298_v21 = vunpack.i.h.bf16 %v1296_v56  ;;  %v1297_v23 = vunpack.i.l.bf16 %v1296_v56 }
  0xa2   : > { %v1286_v57 = vpop.permute.xlu0 %1285  ;;  %v766_v38 = vsel %vm758_vm3, %v1698_v28, %v1298_v21  ;;  %v765_v40 = vsel %vm758_vm3, %v1696_v27, %v1297_v23 }
  0xa3   : > { %v1306_v58 = vpop.permute.xlu1 %1305  ;;  %v1288_v3 = vunpack.i.h.bf16 %v1286_v57  ;;  %v1287_v4 = vunpack.i.l.bf16 %v1286_v57 }
  0xa4   : > { %v1308_v14 = vunpack.i.h.bf16 %v1306_v58  ;;  %v1307_v15 = vunpack.i.l.bf16 %v1306_v58 }
  0xa5   : > { %v764_v24 = vsel %vm758_vm3, %v1709_v41, %v1288_v3  ;;  %v763_v25 = vsel %vm758_vm3, %v1702_v32, %v1287_v4  ;;  %v761_v32 = vsel %vm758_vm3, %v1672_v10, %v1292_v18 }
  0xa6   : > { %v1301_v59 = vpop.permute.xlu0 %1300  ;;  %v772_v12 = vsel %vm767_vm4, %v763_v25, %v1307_v15  ;;  %v773_v26 = vsel %vm767_vm4, %v764_v24, %v1308_v14 }
  0xa7   : > { %v1321_v60 = vpop.permute.xlu1 %1320  ;;  %v1302_v29 = vunpack.i.l.bf16 %v1301_v59  ;;  %v1303_v33 = vunpack.i.h.bf16 %v1301_v59  ;;  %v781_v42 = vsel %vm776_vm5, %v772_v12, %v1277_v5  ;;  %v782_v10 = vsel %vm776_vm5, %v773_v26, %v1278_v16 }
  0xa8   : > { %v1323_v41 = vunpack.i.h.bf16 %v1321_v60  ;;  %v1322_v35 = vunpack.i.l.bf16 %v1321_v60 }
  0xa9   : > { %v768_v11 = vsel %vm767_vm4, %v759_v37, %v1302_v29  ;;  %v769_v17 = vsel %vm767_vm4, %v760_v36, %v1303_v33 }
  0xaa   : > { %v1888_v61 = vpop.permute.xlu0 %1310  ;;  %v774_v45 = vsel %vm767_vm4, %v765_v40, %v1322_v35  ;;  %v775_v27 = vsel %vm767_vm4, %v766_v38, %v1323_v41  ;;  %v777_v51 = vsel %vm776_vm5, %v768_v11, %v1272_v31  ;;  %v778_v55 = vsel %vm776_vm5, %v769_v17, %v1273_v7 }
  0xab   : > { %v1890_v62 = vpop.permute.xlu1 %1325  ;;  %v1313_v13 = vunpack.i.h.bf16 %v1888_v61  ;;  %v1312_v28 = vunpack.i.l.bf16 %v1888_v61 }
  0xac   : > { %v1327_v44 = vunpack.i.l.bf16 %v1890_v62  ;;  %v1328_v46 = vunpack.i.h.bf16 %v1890_v62 }
  0xad   : > { %v771_v58 = vsel %vm767_vm4, %v762_v34, %v1313_v13  ;;  %v770_v59 = vsel %vm767_vm4, %v761_v32, %v1312_v28 }
  0xae   : > { %v1892_v63 = vpop.permute.xlu0 %1315  ;;  %v783_v60 = vsel %vm776_vm5, %v774_v45, %v1327_v44  ;;  %v784_v62 = vsel %vm776_vm5, %v775_v27, %v1328_v46 }
  0xaf   : > { %v1894_v0 = vpop.permute.xlu1 %1335  ;;  %v1317_v47 = vunpack.i.l.bf16 %v1892_v63  ;;  %v1318_v48 = vunpack.i.h.bf16 %v1892_v63 }
  0xb0   : > { %v1338_v49 = vunpack.i.h.bf16 %v1894_v0  ;;  %v1337_v50 = vunpack.i.l.bf16 %v1894_v0 }
  0xb1   : > { %v779_v63 = vsel %vm776_vm5, %v770_v59, %v1317_v47  ;;  %v780_v3 = vsel %vm776_vm5, %v771_v58, %v1318_v48 }
  0xb2   : > { %v1896_v1 = vpop.permute.xlu0 %1330  ;;  %v790_v4 = vsel %vm785_vm6, %v781_v42, %v1337_v50  ;;  %v791_v14 = vsel %vm785_vm6, %v782_v10, %v1338_v49 }
  0xb3   : > { %v1898_v2 = vpop.permute.xlu1 %1345  ;;  %v1333_v53 = vunpack.i.h.bf16 %v1896_v1  ;;  %v1332_v54 = vunpack.i.l.bf16 %v1896_v1 }
  0xb4   : > { %v1347_v56 = vunpack.i.l.bf16 %v1898_v2  ;;  %v1348_v61 = vunpack.i.h.bf16 %v1898_v2 }
  0xb5   : > { %v786_v2 = vsel %vm785_vm6, %v777_v51, %v1332_v54  ;;  %v787_v5 = vsel %vm785_vm6, %v778_v55, %v1333_v53 }
  0xb6   : > { %v1900_v8 = vpop.permute.xlu0 %1340  ;;  %v792_v6 = vsel %vm785_vm6, %v783_v60, %v1347_v56  ;;  %v793_v19 = vsel %vm785_vm6, %v784_v62, %v1348_v61 }
  0xb7   : > { %v1902_v9 = vpop.permute.xlu1 %1355  ;;  %v1343_v0 = vunpack.i.h.bf16 %v1900_v8  ;;  %v1342_v1 = vunpack.i.l.bf16 %v1900_v8 }
  0xb8   : > { %v1357_v15 = vunpack.i.l.bf16 %v1902_v9  ;;  %v1358_v18 = vunpack.i.h.bf16 %v1902_v9 }
  0xb9   : > { %v788_v24 = vsel %vm785_vm6, %v779_v63, %v1342_v1  ;;  %v789_v25 = vsel %vm785_vm6, %v780_v3, %v1343_v0 }
  0xba   : > { %v1904_v22 = vpop.permute.xlu0 %1350  ;;  %v799_v9 = vsel %vm794_vm7, %v790_v4, %v1357_v15 }
  0xbb   : > { %v1910_v30 = vpop.permute.xlu1 %1365  ;;  %v1353_v20 = vunpack.i.h.bf16 %v1904_v22  ;;  %v1352_v21 = vunpack.i.l.bf16 %v1904_v22  ;;  %v800_v22 = vsel %vm794_vm7, %v791_v14, %v1358_v18 }
  0xbc   : > { %v1367_v23 = vunpack.i.l.bf16 %v1910_v30  ;;  %v1368_v29 = vunpack.i.h.bf16 %v1910_v30 }
  0xbd   : > { %v795_v30 = vsel %vm794_vm7, %v786_v2, %v1352_v21  ;;  %v796_v36 = vsel %vm794_vm7, %v787_v5, %v1353_v20 }
  0xbe   : > { %v1926_v39 = vpop.permute.xlu0 %1360  ;;  %v801_v37 = vsel %vm794_vm7, %v792_v6, %v1367_v23 }
  0xbf   : > { %v1933_v43 = vpop.permute.xlu1 %1375  ;;  %v1362_v7 = vunpack.i.l.bf16 %v1926_v39  ;;  %v1363_v12 = vunpack.i.h.bf16 %v1926_v39  ;;  %v802_v39 = vsel %vm794_vm7, %v793_v19, %v1368_v29 }
  0xc0   : > { %v1378_v26 = vunpack.i.h.bf16 %v1933_v43  ;;  %v1377_v33 = vunpack.i.l.bf16 %v1933_v43 }
  0xc1   : > { %v797_v40 = vsel %vm794_vm7, %v788_v24, %v1362_v7  ;;  %v798_v10 = vsel %vm794_vm7, %v789_v25, %v1363_v12 }
  0xc2   : > { %v1371_v52 = vpop.permute.xlu0 %1370  ;;  %v808_v43 = vsel %vm803_vm8, %v799_v9, %v1377_v33  ;;  %v809_v17 = vsel %vm803_vm8, %v800_v22, %v1378_v26 }
  0xc3   : > { %v1386_v57 = vpop.permute.xlu1 %1385  ;;  %v1373_v34 = vunpack.i.h.bf16 %v1371_v52  ;;  %v1372_v41 = vunpack.i.l.bf16 %v1371_v52 }
  0xc4   : > { %v1387_v35 = vunpack.i.l.bf16 %v1386_v57  ;;  %v1388_v38 = vunpack.i.h.bf16 %v1386_v57 }
  0xc5   : > { %v804_v44 = vsel %vm803_vm8, %v795_v30, %v1372_v41  ;;  %v805_v45 = vsel %vm803_vm8, %v796_v36, %v1373_v34 }
  0xc6   : > { %v1963_v16 = vpop.permute.xlu0 %1380  ;;  %v810_v27 = vsel %vm803_vm8, %v801_v37, %v1387_v35  ;;  %v811_v48 = vsel %vm803_vm8, %v802_v39, %v1388_v38 }
  0xc7   : > { %v1396_v8 = vpop.permute.xlu1 %1395  ;;  %v1383_v49 = vunpack.i.h.bf16 %v1963_v16  ;;  %v1382_v56 = vunpack.i.l.bf16 %v1963_v16 }
  0xc8   : > { %v1398_v11 = vunpack.i.h.bf16 %v1396_v8  ;;  %v1397_v42 = vunpack.i.l.bf16 %v1396_v8 }
  0xc9   : > { %v806_v18 = vsel %vm803_vm8, %v797_v40, %v1382_v56  ;;  %v807_v23 = vsel %vm803_vm8, %v798_v10, %v1383_v49 }
  0xca   : > { %v1391_v31 = vpop.permute.xlu0 %1390  ;;  %v817_v54 = vsel %vm812_vm9, %v808_v43, %v1397_v42  ;;  %v818_v55 = vsel %vm812_vm9, %v809_v17, %v1398_v11 }
  0xcb   : > { %v1406_v32 = vpop.permute.xlu1 %1405  ;;  %v1392_v13 = vunpack.i.l.bf16 %v1391_v31  ;;  %v1393_v46 = vunpack.i.h.bf16 %v1391_v31  ;;  %v1115_v31 = vld [vmem:[%s2092_s4] ss:$0 sm:$0xff] }
  0xcc   : > { %v1408_v52 = vunpack.i.h.bf16 %v1406_v32  ;;  %v1407_v53 = vunpack.i.l.bf16 %v1406_v32 }
  0xcd   : > { %v813_v58 = vsel %vm812_vm9, %v804_v44, %v1392_v13  ;;  %v814_v0 = vsel %vm812_vm9, %v805_v45, %v1393_v46 }
  0xce   : > { %v1401_v28 = vpop.permute.xlu0 %1400  ;;  %v819_v2 = vsel %vm812_vm9, %v810_v27, %v1407_v53  ;;  %v820_v16 = vsel %vm812_vm9, %v811_v48, %v1408_v52 }
  0xcf   : > { %v1416_v47 = vpop.permute.xlu1 %1415  ;;  %v1403_v3 = vunpack.i.h.bf16 %v1401_v28  ;;  %v1402_v4 = vunpack.i.l.bf16 %v1401_v28 }
  0xd0   : > { %v1418_v50 = vunpack.i.h.bf16 %v1416_v47  ;;  %v1417_v51 = vunpack.i.l.bf16 %v1416_v47 }
  0xd1   : > { %v815_v7 = vsel %vm812_vm9, %v806_v18, %v1402_v4  ;;  %v816_v9 = vsel %vm812_vm9, %v807_v23, %v1403_v3 }
  0xd2   : > { %v1411_v57 = vpop.permute.xlu0 %1410  ;;  %v826_v59 = vsel %vm821_vm10, %v817_v54, %v1417_v51  ;;  %v827_v60 = vsel %vm821_vm10, %v818_v55, %v1418_v50 }
  0xd3   : > { %v1413_v61 = vunpack.i.h.bf16 %v1411_v57  ;;  %v1412_v62 = vunpack.i.l.bf16 %v1411_v57  ;;  %v1426_v63 = vpop.permute.xlu1 %1425  ;;  %v832_v1 = vpack.c.bf16 %v827_v60, %v826_v59 }
  0xd4   : > { %v1428_v14 = vunpack.i.h.bf16 %v1426_v63  ;;  %v1427_v15 = vunpack.i.l.bf16 %v1426_v63 }
  0xd5   : > { %v822_v5 = vsel %vm821_vm10, %v813_v58, %v1412_v62  ;;  %v823_v6 = vsel %vm821_vm10, %v814_v0, %v1413_v61  ;;  %1175 = vmatprep.mubr.msk.bf16.mxu1 %vm861_vm11, %v832_v1 }
  0xd6   : > { %v828_v8 = vsel %vm821_vm10, %v819_v2, %v1427_v15  ;;  %v829_v19 = vsel %vm821_vm10, %v820_v16, %v1428_v14  ;;  %v1421_v20 = vpop.permute.xlu0 %1420  ;;  %v830_v21 = vpack.c.bf16 %v823_v6, %v822_v5 }
  0xd7   : > { %v833_v24 = vpack.c.bf16 %v829_v19, %v828_v8  ;;  %v1423_v25 = vunpack.i.h.bf16 %v1421_v20  ;;  %v1422_v29 = vunpack.i.l.bf16 %v1421_v20 }
  0xd8   : > { %1171 = vmatprep.mubr.msk.bf16.mxu0 %vm861_vm11, %v830_v21 }
  0xd9   : > { %v824_v12 = vsel %vm821_vm10, %v815_v7, %v1422_v29  ;;  %v825_v26 = vsel %vm821_vm10, %v816_v9, %v1423_v25  ;;  %1176 = vmatmul.mubr.msk.bf16.vlgmr.msra.gmra.mrb[0].mxu1 %vm861_vm11, %v833_v24 }
  0xda   : > { %v831_v33 = vpack.c.bf16 %v825_v26, %v824_v12 }
  0xdc   : > { %1172 = vmatmul.mubr.msk.bf16.vlgmr.msra.gmra.mrb[0].mxu0 %vm861_vm11, %v831_v33 }
 0x1ac   : > { %v1177_v22 = vpop.f32.mrb[0].mxu1 }
 0x1ad   : > { %v937_v34 = vadd.f32 %v1177_v22, %v1115_v31  ;;  %v928_v41 = vpop.f32.mrb[1].mxu1 }
 0x1ae   : > { %v929_v35 = vadd.f32 %v1115_v31, %v928_v41  ;;  %v1178_v32 = vpop.f32.mrb[2].mxu1 }
 0x1af   : > { %v1173_v30 = vpop.f32.mrb[0].mxu0  ;;  %v949_v36 = vmax.f32 %v937_v34, 0.0  ;;  %v940_v37 = vadd.f32 %v1178_v32, %v1115_v31  ;;  %v931_v38 = vpop.f32.mrb[3].mxu1 }
 0x1b0   : > { %v921_v39 = vadd.f32 %v1173_v30, %v1115_v31  ;;  %v912_v40 = vpop.f32.mrb[1].mxu0  ;;  %v947_v11 = vmax.f32 %v929_v35, 0.0  ;;  %v932_v42 = vadd.f32 %v1115_v31, %v931_v38 }
 0x1b1   : > { %957 = vst [vmem:[%s300_s13 + $0x30] sm:$0xff] %v949_v36  ;;  %v913_v10 = vadd.f32 %v1115_v31, %v912_v40  ;;  %v1174_v43 = vpop.f32.mrb[2].mxu0  ;;  %v950_v17 = vmax.f32 %v940_v37, 0.0 }
 0x1b2   : > { %v945_v13 = vmax.f32 %v921_v39, 0.0  ;;  %955 = vst [vmem:[%s300_s13 + $0x20] sm:$0xff] %v947_v11  ;;  %v924_v28 = vadd.f32 %v1174_v43, %v1115_v31  ;;  %v915_v44 = vpop.f32.mrb[3].mxu0  ;;  %v948_v45 = vmax.f32 %v932_v42, 0.0 }
 0x1b3   : > { %v943_v27 = vmax.f32 %v913_v10, 0.0  ;;  %958 = vst [vmem:[%s300_s13 + $0x38] sm:$0xff] %v950_v17  ;;  %v916_v46 = vadd.f32 %v1115_v31, %v915_v44 }
 0x1b4   : > { %953 = vst [vmem:[%s300_s13 + $0x10] sm:$0xff] %v945_v13  ;;  %v946_v47 = vmax.f32 %v924_v28, 0.0  ;;  %956 = vst [vmem:[%s300_s13 + $0x28] sm:$0xff] %v948_v45 }
 0x1b5   : > { %951 = vst [vmem:[%s300_s13] sm:$0xff] %v943_v27  ;;  %v944_v48 = vmax.f32 %v916_v46, 0.0 }
 0x1b6   : > { %954 = vst [vmem:[%s300_s13 + $0x18] sm:$0xff] %v946_v47 }
 0x1b7   : > { %952 = vst [vmem:[%s300_s13 + $0x8] sm:$0xff] %v944_v48 }
 0x1b8   : > { %1445 = shalt.err (!%p1442_p7)
}
 0x1b9   : > { %s1446_s27 = scalar_lea.hbm %s2031_s26, 1024  ;;  %s1450_s22 = scalar_lea.hbm %s2093_s5, 8192 }
 0x1ba   : > { %p1447_p9 = scmp.ne.s32.totalorder %s2031_s26, %s1446_s27  ;;  %p1451_p12 = scmp.lt.u32.totalorder %s2031_s26, %s2093_s5 }
 0x1bb   : > { %p1452_p13 = scmp.lt.u32.totalorder %s1450_s22, %s1446_s27  ;;  %p1454_p1 = scmp.lt.u32.totalorder %s1446_s27, %s2031_s26 }
 0x1bc   : > { %p1448_p10 = pnand %p1447_p9, %p1619_p3 }
 0x1bd   : > { %p1453_p0 = por %p1452_p13, %p1451_p12 }
 0x1be   : > { %p1449_p11 = pneg %p1448_p10 }
 0x1bf   : > { %p1455_p2 = por %p1454_p1, %p1453_p0 }
 0x1c1   : > { %p1456_p4 = pnand %p1455_p2, %p1449_p11 }
 0x1c3   : > { %1459 = shalt.err (!%p1456_p4)
}
 0x1c4   : > { %s1537_s30 = smov 128  }
 0x1c5   : > { %1189 = dma.vmem_to_hbm [thread:$0]  (%p1619_p3), %s2026_s21, 1024, %s2031_s26, %s2035_s17, %s1537_s30, %s1537_s30, %s1530_s14  }
 0x1c6 PF: > { %p1195_p5 = scmp.ge.s32.totalorder %s1526_s25, 2  ;;  %s991_s8 = sand.u32 1, %s1498_s18  }
 0x1c7   : > { %s992_s9 = scalar_lea.sflag [#allocation3], %s991_s8 }
 0x1c8   : > { %p1192_p6 = pnand %p1195_p5, %p1628_p8 }
 0x1ca   : > { %1493 = dma.done.wait (!%p1192_p6), %s992_s9, 1024  }
 0x1cb   : > { %1495 = vsyncadd (!%p1192_p6), %s992_s9, 4294966272  ;;  %s18_s25 = sadd.s32 1, %s1526_s25   ;;  %s2096_s18 = smov %s1502_s19 }
 0x1cc   : > { %p15_p7 = scmp.ge.s32.totalorder %s18_s25, 10   ;;  %s2097_s19 = smov %s1506_s20 }
 0x1cd   : > { %s2098_s20 = smov %s1637_s11  ;;  %s2099_s21 = smov %s1518_s23 }
 0x1ce   : > { %s2100_s22 = smov %s1522_s24  ;;  %s2101_s23 = smov %s2104_s28 }
 0x1cf   : > { %s2102_s24 = smov %s2108_s29  ;;  %17 = sbr.rel (!%p15_p7) target bundleno = 5 (0x5), region = 81 }
 0x1d6   :  { %997 = vsyncpa [#allocation3], 1 }
 0x1d7   :  { %999 = vsyncpa [#allocation3 + $0x1], 1 }

</bundles_post_ra>
